<compile_context>
chip_gen: v6e
topology: v6e:2x2x1
jax: 0.10.0
libtpu: 0.0.40
codegen_flags: <defaults>
</compile_context>

<pallas_src>
import functools
import math

import jax
import jax.numpy as jnp
from jax.experimental import pallas as pl
from jax.experimental.pallas import tpu as pltpu


def _round_up(x, m):
    return ((x + m - 1) // m) * m


def _largest_divisor_leq(n, cap):
    cap = max(1, min(cap, n))
    for k in range(cap, 0, -1):
        if n % k == 0:
            return k
    return 1


def _mmd_colsum_kernel(x_ref, y_ref, ox_ref, oy_ref, *,
                       gx, gy, sx_steps, sy_steps, steps,
                       nfx, nfy, tile_x, tile_y):
    """Per-core, sublane-preserving column-sum accumulation over row blocks.

    x_ref, y_ref : (tile, fd) blocks of the (lane-folded) source / target.
    ox_ref, oy_ref: (1, 8, fd) f32 per-core partial-sum outputs (resident
                    accumulators across the "arbitrary" step axis).
    """
    c = pl.program_id(0)   # core-split axis ("parallel")
    i = pl.program_id(1)   # streaming reduction axis ("arbitrary")

    @pl.when(i == 0)
    def _init():
        ox_ref[...] = jnp.zeros(ox_ref.shape, ox_ref.dtype)
        oy_ref[...] = jnp.zeros(oy_ref.shape, oy_ref.dtype)

    def accumulate(ref, acc_ref, b, n_rows, tile, g, s_steps):
        fd = ref.shape[-1]
        has_partial = (n_rows % tile) != 0

        def add_full():
            blk = ref[...].astype(jnp.float32)
            acc_ref[...] += blk.reshape(tile // 8, 8, fd).sum(axis=0)[None]

        def add_masked():
            # Only the last (partial) block pays for the mask; OOB/garbage tail
            # rows (possibly NaN/Inf) are zeroed by the select.
            blk = ref[...].astype(jnp.float32)
            rows = jax.lax.broadcasted_iota(jnp.int32, (tile, 1), 0)
            valid = (b * tile + rows) < n_rows
            blk = jnp.where(valid, blk, 0.0)
            acc_ref[...] += blk.reshape(tile // 8, 8, fd).sum(axis=0)[None]

        def contrib():
            if has_partial:
                pl.when(b == g - 1)(add_masked)
                pl.when(b != g - 1)(add_full)
            else:
                add_full()

        # Skip grid steps that own no block of this input (DMA already skipped
        # by the clamped index_map); fold the gate away when statically true.
        always_valid = (s_steps == steps) and (g == 2 * s_steps)
        if always_valid:
            contrib()
        else:
            cond = b < g
            if s_steps < steps:
                cond = jnp.logical_and(i < s_steps, cond)
            pl.when(cond)(contrib)

    accumulate(x_ref, ox_ref, c * sx_steps + i, nfx, tile_x, gx, sx_steps)
    accumulate(y_ref, oy_ref, c * sy_steps + i, nfy, tile_y, gy, sy_steps)


def mmd_linear_pallas(fea_source, fea_target, *, tile_rows=None):
    """Pallas equivalent of MMDLinear.forward (scalar float32 loss).

    tile_rows (optional) overrides the block row count *of the lane-folded*
    matrices (mostly for tests); by default blocks are sized by bytes.
    """
    n_s, d_s = fea_source.shape
    n_t, d_t = fea_target.shape
    assert d_s == d_t, "feature dims must match"
    assert n_s > 0 and n_t > 0, "empty inputs not supported"
    d = d_s

    # --- lane-dense packing for narrow feature dims -------------------------
    # (n, d) -> (n // k, k * d) is a free row-major reshape; column sums of the
    # folded matrix fold back exactly to column sums of the original.
    k_cap = max(1, 128 // d)
    kx = _largest_divisor_leq(n_s, k_cap)
    ky = _largest_divisor_leq(n_t, k_cap)
    nfx, fdx = n_s // kx, kx * d
    nfy, fdy = n_t // ky, ky * d
    xf = fea_source.reshape(nfx, fdx)
    yf = fea_target.reshape(nfy, fdy)

    # --- generation-aware VMEM budget / block sizing ------------------------
    try:
        vmem_cap = int(pltpu.get_tpu_info().vmem_capacity_bytes)
    except Exception:
        vmem_cap = 64 * 1024 * 1024   # conservative fallback (v7x per-core VMEM)
    # 2 inputs x 2 pipeline buffers in flight; leave headroom for the tiny
    # partial-sum outputs and internal scratch under the scoped limit we set.
    inflight_budget = min(int(vmem_cap * 0.6), 56 << 20)
    per_block_budget = max(inflight_budget // 4, 1 << 20)
    vmem_limit = int(min(max(vmem_cap - (8 << 20), inflight_budget + (4 << 20)),
                         100 << 20))

    def pick_tile(n_rows, fd, itemsize):
        if tile_rows is not None:
            t = int(tile_rows)
        else:
            t = per_block_budget // max(fd * itemsize, 1)
        t = max(8, (t // 8) * 8)              # multiple of 8 (sublane reshape)
        t = min(t, _round_up(n_rows, 8))
        return int(t)

    tile_x = pick_tile(nfx, fdx, jnp.dtype(xf.dtype).itemsize)
    tile_y = pick_tile(nfy, fdy, jnp.dtype(yf.dtype).itemsize)

    gx = int(pl.cdiv(nfx, tile_x))
    gy = int(pl.cdiv(nfy, tile_y))
    # Split the block stream across 2 TensorCores (leading "parallel" axis).
    # On single-TC chips (v5e/v6e) this is the same serial loop, relabeled.
    sx_steps = int(pl.cdiv(gx, 2))
    sy_steps = int(pl.cdiv(gy, 2))
    steps = max(sx_steps, sy_steps)

    kernel = functools.partial(
        _mmd_colsum_kernel,
        gx=gx, gy=gy, sx_steps=sx_steps, sy_steps=sy_steps, steps=steps,
        nfx=nfx, nfy=nfy, tile_x=tile_x, tile_y=tile_y)

    ox, oy = pl.pallas_call(
        kernel,
        out_shape=(jax.ShapeDtypeStruct((2, 8, fdx), jnp.float32),
                   jax.ShapeDtypeStruct((2, 8, fdy), jnp.float32)),
        grid_spec=pltpu.PrefetchScalarGridSpec(
            num_scalar_prefetch=0,
            grid=(2, steps),
            in_specs=[
                pl.BlockSpec(
                    (tile_x, fdx),
                    lambda c, i: (jnp.minimum(c * sx_steps + i, gx - 1), 0)),
                pl.BlockSpec(
                    (tile_y, fdy),
                    lambda c, i: (jnp.minimum(c * sy_steps + i, gy - 1), 0)),
            ],
            out_specs=(
                pl.BlockSpec((1, 8, fdx), lambda c, i: (c, 0, 0)),
                pl.BlockSpec((1, 8, fdy), lambda c, i: (c, 0, 0)),
            ),
        ),
        compiler_params=pltpu.CompilerParams(
            dimension_semantics=("parallel", "arbitrary"),
            vmem_limit_bytes=vmem_limit),
    )(xf, yf)

    # Tiny wrapper epilogue: fold core / sublane / lane-fold partials, then
    # loss = || mean(X,0) - mean(Y,0) ||^2  (== mean(delta @ delta.T)).
    sum_x = jnp.sum(ox.reshape(2 * 8, kx, d), axis=(0, 1))
    sum_y = jnp.sum(oy.reshape(2 * 8, ky, d), axis=(0, 1))
    diff = sum_x / n_s - sum_y / n_t
    return jnp.sum(diff * diff)


def mmd_linear_ref(fea_source, fea_target):
    """Plain-JAX reference mirroring the PyTorch module literally."""
    n_s, _ = fea_source.shape
    n_t, _ = fea_target.shape
    if n_s != n_t:
        n = (n_s * n_t) // math.gcd(n_s, n_t)
        fea_source = jnp.tile(fea_source, (n // n_s, 1))
        fea_target = jnp.tile(fea_target, (n // n_t, 1))
    delta = (fea_source - fea_target).astype(jnp.float32)
    return jnp.mean(delta @ delta.T)


if __name__ == "__main__":
    # MMDLinear has no learnable parameters; only inputs are needed.
    key = jax.random.PRNGKey(0)
    ks = jax.random.split(key, 4)

    cases = [
        # Mismatched batch sizes -> exercises the lcm/repeat semantics (lcm(8,12)=24).
        ((8, 32), (12, 32), None),
        # Equal batch sizes (common case); d=32 exercises lane folding k=4.
        ((16, 32), (16, 32), None),
        # Multi-block grid, unequal block counts, partial last blocks, both
        # halves of the 2-way core split (forced small tile).
        ((100, 48), (36, 48), 8),
        # Odd sizes / folded lane dims that are not multiples of 128.
        ((7, 10), (5, 10), None),
    ]

    for idx, (shp_s, shp_t, tile) in enumerate(cases):
        k1, k2 = jax.random.split(ks[idx], 2)
        fs = jax.random.normal(k1, shp_s, dtype=jnp.float32)
        ft = jax.random.normal(k2, shp_t, dtype=jnp.float32)
        loss = jax.block_until_ready(mmd_linear_pallas(fs, ft, tile_rows=tile))
        ref = jax.block_until_ready(mmd_linear_ref(fs, ft))
        assert jnp.allclose(loss, ref, rtol=5e-4, atol=1e-5), (shp_s, shp_t, loss, ref)

    print("KERNEL_OK")
</pallas_src>

<mosaic_0001>
module attributes {stable_mosaic.version = 11 : i64} {
  func.func @_mmd_colsum_kernel(%arg0: i32, %arg1: i32, %arg2: memref<8x128xf32, #tpu.memory_space<vmem>>, %arg3: memref<8x128xf32, #tpu.memory_space<vmem>>, %arg4: memref<1x8x128xf32, #tpu.memory_space<vmem>>, %arg5: memref<1x8x128xf32, #tpu.memory_space<vmem>>) attributes {dimension_semantics = [#tpu.dimension_semantics<parallel>, #tpu.dimension_semantics<arbitrary>], iteration_bounds = array<i64: 2, 1>, scalar_prefetch = 0 : i64, scratch_operands = 0 : i64, tpu.core_type = #tpu.core_type<tc>, window_params = [{transform_indices = @transform_0, window_bounds = array<i64: 8, 128>}, {transform_indices = @transform_1, window_bounds = array<i64: 8, 128>}, {transform_indices = @transform_2, window_bounds = array<i64: 1, 8, 128>}, {transform_indices = @transform_3, window_bounds = array<i64: 1, 8, 128>}]} {
    %c0_i32 = arith.constant 0 : i32
    %0 = arith.cmpi eq, %arg1, %c0_i32 : i32
    %1 = arith.extui %0 : i1 to i32
    %c0_i32_0 = arith.constant 0 : i32
    %2 = arith.cmpi ne, %1, %c0_i32_0 : i32
    scf.if %2 {
      %cst = arith.constant 0.000000e+00 : f32
      %13 = vector.broadcast %cst : f32 to vector<1x8x128xf32>
      %c0 = arith.constant 0 : index
      %c0_6 = arith.constant 0 : index
      %c0_7 = arith.constant 0 : index
      %14 = vector.load %arg4[%c0, %c0_6, %c0_7] : memref<1x8x128xf32, #tpu.memory_space<vmem>>, vector<1x8x128xf32>
      tpu.vector_store %arg4[%c0, %c0_6, %c0_7], %13 {strides = array<i32>} : memref<1x8x128xf32, #tpu.memory_space<vmem>>, vector<1x8x128xf32>,
      %cst_8 = arith.constant 0.000000e+00 : f32
      %15 = vector.broadcast %cst_8 : f32 to vector<1x8x128xf32>
      %c0_9 = arith.constant 0 : index
      %c0_10 = arith.constant 0 : index
      %c0_11 = arith.constant 0 : index
      %16 = vector.load %arg5[%c0_9, %c0_10, %c0_11] : memref<1x8x128xf32, #tpu.memory_space<vmem>>, vector<1x8x128xf32>
      tpu.vector_store %arg5[%c0_9, %c0_10, %c0_11], %15 {strides = array<i32>} : memref<1x8x128xf32, #tpu.memory_space<vmem>>, vector<1x8x128xf32>,
    } else {
    }
    %c1_i32 = arith.constant 1 : i32
    %3 = arith.muli %arg0, %c1_i32 : i32
    %4 = arith.addi %3, %arg1 : i32
    %c1_i32_1 = arith.constant 1 : i32
    %5 = arith.cmpi slt, %4, %c1_i32_1 : i32
    %6 = arith.extui %5 : i1 to i32
    %c0_i32_2 = arith.constant 0 : i32
    %7 = arith.cmpi ne, %6, %c0_i32_2 : i32
    scf.if %7 {
      %c0_i32_6 = arith.constant 0 : i32
      %13 = arith.cmpi eq, %4, %c0_i32_6 : i32
      %14 = arith.extui %13 : i1 to i32
      %c0_i32_7 = arith.constant 0 : i32
      %15 = arith.cmpi ne, %14, %c0_i32_7 : i32
      scf.if %15 {
        %c0 = arith.constant 0 : index
        %c0_10 = arith.constant 0 : index
        %19 = vector.load %arg2[%c0, %c0_10] : memref<8x128xf32, #tpu.memory_space<vmem>>, vector<8x128xf32>
        %20 = tpu.iota {dimensions = array<i32: 0>} : vector<8x1xi32>
        %c8_i32 = arith.constant 8 : i32
        %21 = arith.muli %4, %c8_i32 : i32
        %22 = vector.broadcast %21 : i32 to vector<8x1xi32>
        %23 = arith.addi %22, %20 : vector<8x1xi32>
        %c2_i32 = arith.constant 2 : i32
        %24 = vector.broadcast %c2_i32 : i32 to vector<8x1xi32>
        %25 = arith.cmpi slt, %23, %24 : vector<8x1xi32>
        %cst = arith.constant 0.000000e+00 : f32
        %26 = vector.shape_cast %25 : vector<8x1xi1> to vector<8x1xi1>
        %27 = vector.broadcast %26 : vector<8x1xi1> to vector<8x128xi1>
        %28 = vector.broadcast %cst : f32 to vector<8x128xf32>
        %29 = arith.select %27, %19, %28 : vector<8x128xi1>, vector<8x128xf32>
        %c0_11 = arith.constant 0 : index
        %c0_12 = arith.constant 0 : index
        %c0_13 = arith.constant 0 : index
        %30 = vector.load %arg4[%c0_11, %c0_12, %c0_13] : memref<1x8x128xf32, #tpu.memory_space<vmem>>, vector<1x8x128xf32>
        %31 = vector.shape_cast %29 : vector<8x128xf32> to vector<1x8x128xf32>
        %cst_14 = arith.constant dense<0.000000e+00> : vector<8x128xf32>
        %32 = vector.multi_reduction <add>, %31, %cst_14 [0] : vector<1x8x128xf32> to vector<8x128xf32>
        %33 = vector.shape_cast %32 : vector<8x128xf32> to vector<1x8x128xf32>
        %34 = arith.addf %30, %33 : vector<1x8x128xf32>
        %c0_15 = arith.constant 0 : index
        %c0_16 = arith.constant 0 : index
        %c0_17 = arith.constant 0 : index
        %35 = vector.load %arg4[%c0_15, %c0_16, %c0_17] : memref<1x8x128xf32, #tpu.memory_space<vmem>>, vector<1x8x128xf32>
        tpu.vector_store %arg4[%c0_15, %c0_16, %c0_17], %34 {strides = array<i32>} : memref<1x8x128xf32, #tpu.memory_space<vmem>>, vector<1x8x128xf32>,
      } else {
      }
      %c0_i32_8 = arith.constant 0 : i32
      %16 = arith.cmpi ne, %4, %c0_i32_8 : i32
      %17 = arith.extui %16 : i1 to i32
      %c0_i32_9 = arith.constant 0 : i32
      %18 = arith.cmpi ne, %17, %c0_i32_9 : i32
      scf.if %18 {
        %c0 = arith.constant 0 : index
        %c0_10 = arith.constant 0 : index
        %19 = vector.load %arg2[%c0, %c0_10] : memref<8x128xf32, #tpu.memory_space<vmem>>, vector<8x128xf32>
        %c0_11 = arith.constant 0 : index
        %c0_12 = arith.constant 0 : index
        %c0_13 = arith.constant 0 : index
        %20 = vector.load %arg4[%c0_11, %c0_12, %c0_13] : memref<1x8x128xf32, #tpu.memory_space<vmem>>, vector<1x8x128xf32>
        %21 = vector.shape_cast %19 : vector<8x128xf32> to vector<1x8x128xf32>
        %cst = arith.constant dense<0.000000e+00> : vector<8x128xf32>
        %22 = vector.multi_reduction <add>, %21, %cst [0] : vector<1x8x128xf32> to vector<8x128xf32>
        %23 = vector.shape_cast %22 : vector<8x128xf32> to vector<1x8x128xf32>
        %24 = arith.addf %20, %23 : vector<1x8x128xf32>
        %c0_14 = arith.constant 0 : index
        %c0_15 = arith.constant 0 : index
        %c0_16 = arith.constant 0 : index
        %25 = vector.load %arg4[%c0_14, %c0_15, %c0_16] : memref<1x8x128xf32, #tpu.memory_space<vmem>>, vector<1x8x128xf32>
        tpu.vector_store %arg4[%c0_14, %c0_15, %c0_16], %24 {strides = array<i32>} : memref<1x8x128xf32, #tpu.memory_space<vmem>>, vector<1x8x128xf32>,
      } else {
      }
    } else {
    }
    %c1_i32_3 = arith.constant 1 : i32
    %8 = arith.muli %arg0, %c1_i32_3 : i32
    %9 = arith.addi %8, %arg1 : i32
    %c1_i32_4 = arith.constant 1 : i32
    %10 = arith.cmpi slt, %9, %c1_i32_4 : i32
    %11 = arith.extui %10 : i1 to i32
    %c0_i32_5 = arith.constant 0 : i32
    %12 = arith.cmpi ne, %11, %c0_i32_5 : i32
    scf.if %12 {
      %c0_i32_6 = arith.constant 0 : i32
      %13 = arith.cmpi eq, %9, %c0_i32_6 : i32
      %14 = arith.extui %13 : i1 to i32
      %c0_i32_7 = arith.constant 0 : i32
      %15 = arith.cmpi ne, %14, %c0_i32_7 : i32
      scf.if %15 {
        %c0 = arith.constant 0 : index
        %c0_10 = arith.constant 0 : index
        %19 = vector.load %arg3[%c0, %c0_10] : memref<8x128xf32, #tpu.memory_space<vmem>>, vector<8x128xf32>
        %20 = tpu.iota {dimensions = array<i32: 0>} : vector<8x1xi32>
        %c8_i32 = arith.constant 8 : i32
        %21 = arith.muli %9, %c8_i32 : i32
        %22 = vector.broadcast %21 : i32 to vector<8x1xi32>
        %23 = arith.addi %22, %20 : vector<8x1xi32>
        %c3_i32 = arith.constant 3 : i32
        %24 = vector.broadcast %c3_i32 : i32 to vector<8x1xi32>
        %25 = arith.cmpi slt, %23, %24 : vector<8x1xi32>
        %cst = arith.constant 0.000000e+00 : f32
        %26 = vector.shape_cast %25 : vector<8x1xi1> to vector<8x1xi1>
        %27 = vector.broadcast %26 : vector<8x1xi1> to vector<8x128xi1>
        %28 = vector.broadcast %cst : f32 to vector<8x128xf32>
        %29 = arith.select %27, %19, %28 : vector<8x128xi1>, vector<8x128xf32>
        %c0_11 = arith.constant 0 : index
        %c0_12 = arith.constant 0 : index
        %c0_13 = arith.constant 0 : index
        %30 = vector.load %arg5[%c0_11, %c0_12, %c0_13] : memref<1x8x128xf32, #tpu.memory_space<vmem>>, vector<1x8x128xf32>
        %31 = vector.shape_cast %29 : vector<8x128xf32> to vector<1x8x128xf32>
        %cst_14 = arith.constant dense<0.000000e+00> : vector<8x128xf32>
        %32 = vector.multi_reduction <add>, %31, %cst_14 [0] : vector<1x8x128xf32> to vector<8x128xf32>
        %33 = vector.shape_cast %32 : vector<8x128xf32> to vector<1x8x128xf32>
        %34 = arith.addf %30, %33 : vector<1x8x128xf32>
        %c0_15 = arith.constant 0 : index
        %c0_16 = arith.constant 0 : index
        %c0_17 = arith.constant 0 : index
        %35 = vector.load %arg5[%c0_15, %c0_16, %c0_17] : memref<1x8x128xf32, #tpu.memory_space<vmem>>, vector<1x8x128xf32>
        tpu.vector_store %arg5[%c0_15, %c0_16, %c0_17], %34 {strides = array<i32>} : memref<1x8x128xf32, #tpu.memory_space<vmem>>, vector<1x8x128xf32>,
      } else {
      }
      %c0_i32_8 = arith.constant 0 : i32
      %16 = arith.cmpi ne, %9, %c0_i32_8 : i32
      %17 = arith.extui %16 : i1 to i32
      %c0_i32_9 = arith.constant 0 : i32
      %18 = arith.cmpi ne, %17, %c0_i32_9 : i32
      scf.if %18 {
        %c0 = arith.constant 0 : index
        %c0_10 = arith.constant 0 : index
        %19 = vector.load %arg3[%c0, %c0_10] : memref<8x128xf32, #tpu.memory_space<vmem>>, vector<8x128xf32>
        %c0_11 = arith.constant 0 : index
        %c0_12 = arith.constant 0 : index
        %c0_13 = arith.constant 0 : index
        %20 = vector.load %arg5[%c0_11, %c0_12, %c0_13] : memref<1x8x128xf32, #tpu.memory_space<vmem>>, vector<1x8x128xf32>
        %21 = vector.shape_cast %19 : vector<8x128xf32> to vector<1x8x128xf32>
        %cst = arith.constant dense<0.000000e+00> : vector<8x128xf32>
        %22 = vector.multi_reduction <add>, %21, %cst [0] : vector<1x8x128xf32> to vector<8x128xf32>
        %23 = vector.shape_cast %22 : vector<8x128xf32> to vector<1x8x128xf32>
        %24 = arith.addf %20, %23 : vector<1x8x128xf32>
        %c0_14 = arith.constant 0 : index
        %c0_15 = arith.constant 0 : index
        %c0_16 = arith.constant 0 : index
        %25 = vector.load %arg5[%c0_14, %c0_15, %c0_16] : memref<1x8x128xf32, #tpu.memory_space<vmem>>, vector<1x8x128xf32>
        tpu.vector_store %arg5[%c0_14, %c0_15, %c0_16], %24 {strides = array<i32>} : memref<1x8x128xf32, #tpu.memory_space<vmem>>, vector<1x8x128xf32>,
      } else {
      }
    } else {
    }
    return
  }
  func.func @transform_0(%arg0: i32, %arg1: i32) -> (i32, i32) {
    %c1_i32 = arith.constant 1 : i32
    %0 = arith.muli %arg0, %c1_i32 : i32
    %1 = arith.addi %0, %arg1 : i32
    %c0_i32 = arith.constant 0 : i32
    %2 = arith.minsi %1, %c0_i32 : i32
    %c0_i32_0 = arith.constant 0 : i32
    %c0_i32_1 = arith.constant 0 : i32
    return %2, %c0_i32_0 : i32, i32
  }
  func.func @transform_1(%arg0: i32, %arg1: i32) -> (i32, i32) {
    %c1_i32 = arith.constant 1 : i32
    %0 = arith.muli %arg0, %c1_i32 : i32
    %1 = arith.addi %0, %arg1 : i32
    %c0_i32 = arith.constant 0 : i32
    %2 = arith.minsi %1, %c0_i32 : i32
    %c0_i32_0 = arith.constant 0 : i32
    %c0_i32_1 = arith.constant 0 : i32
    return %2, %c0_i32_0 : i32, i32
  }
  func.func @transform_2(%arg0: i32, %arg1: i32) -> (i32, i32, i32) {
    %c0_i32 = arith.constant 0 : i32
    %c0_i32_0 = arith.constant 0 : i32
    %c0_i32_1 = arith.constant 0 : i32
    return %arg0, %c0_i32, %c0_i32_0 : i32, i32, i32
  }
  func.func @transform_3(%arg0: i32, %arg1: i32) -> (i32, i32, i32) {
    %c0_i32 = arith.constant 0 : i32
    %c0_i32_0 = arith.constant 0 : i32
    %c0_i32_1 = arith.constant 0 : i32
    return %arg0, %c0_i32, %c0_i32_0 : i32, i32, i32
  }
}

</mosaic_0001>

<bundles_post_ra>
// kernel: tpu_custom_call.1
= control target key start
LH: loop header
LB: loop body
LE: loop exit
PB: predicated region body
PF: predicated region fallthrough
CT: control target
= control target key end

     0   :  { %9 = vsyncpa [#allocation3], 0  ;;  %s1083_s0 = inlined_call_operand.hbm [shape: f32[2,128], index: 0, kind: input, shape index: {}]   ;;  %s1084_s1 = inlined_call_operand.hbm [shape: f32[3,128], index: 1, kind: input, shape index: {}]   ;;  %s1085_s2 = inlined_call_operand.hbm [shape: f32[2,8,128], index: 2, kind: output, shape index: {0}]   ;;  %s1086_s3 = inlined_call_operand.hbm [shape: f32[2,8,128], index: 3, kind: output, shape index: {1}]  }
   0x1   :  { %11 = vsyncpa [#allocation3 + $0x1], 0 }
   0x2   :  { %12 = vsyncpa [#allocation6], 0 }
   0x3   :  { %14 = vsyncpa [#allocation6 + $0x1], 0 }
   0x4   :  { %15 = vsyncpa [#allocation4], 0 }
   0x5   :  { %17 = vsyncpa [#allocation4 + $0x1], 0 }
   0x6   :  { %18 = vsyncpa [#allocation9], 0 }
   0x7   :  { %20 = vsyncpa [#allocation9 + $0x1], 0  ;;  %s869_s12 = smov 0   ;;  %s871_s13 = smov 0  }
   0x8   :  { %s873_s14 = smov 0   ;;  %s875_s15 = smov 0  }
   0x9   :  { %s877_s16 = smov 0   ;;  %s879_s17 = smov 0  }
   0xa   :  { %s881_s18 = smov 0   ;;  %s883_s19 = smov 0  }
   0xb LB: > { %s518_s20 = sadd.s32 4294967295, %s838_s19   ;;  %s519_s21 = sadd.s32 4294967294, %s838_s19   ;;  %s838_s19 = sphi %s883_s19, %s26_s19   ;;  %s834_s18 = sphi %s881_s18, %s1098_s18   ;;  %s830_s17 = sphi %s879_s17, %s1097_s17   ;;  %s826_s16 = sphi %s877_s16, %s1073_s16   ;;  %s822_s15 = sphi %s875_s15, %s1096_s15   ;;  %s818_s14 = sphi %s873_s14, %s1095_s14   ;;  %s814_s13 = sphi %s871_s13, %s1094_s13   ;;  %s810_s12 = sphi %s869_s12, %s1093_s12  }
   0xc   : > { %s38_s22 = sadd.s32 1, %s834_s18  ;;  %p807_p1 = scmp.ne.s32.totalorder %s826_s16, 0 }
   0xd   : > { %p40_p0 = scmp.ge.s32.totalorder %s38_s22, 2  ;;  %p59_p2 = scmp.eq.s32.totalorder %s838_s19, 0 }
   0xe   : > { %p64_p3 = scmp.ne.s32.totalorder %s826_s16, %s822_s15  ;;  %p65_p5 = scmp.eq.s32.totalorder %s518_s20, 0 }
   0xf   : > { %s1100_s22 = smov (%p40_p0, %s38_s22), 0  ;;  %p915_p4 = por %p807_p1, %p59_p2 }
  0x10   : > { %p919_p6 = por %p65_p5, %p64_p3  ;;  %s106_s25 = ssub.s32 %s834_s18, %s1100_s22 }
  0x11   : > { %p107_p7 = scmp.eq.s32.totalorder %s106_s25, 0  ;;  %s109_s26 = sadd.s32 1, %s818_s14 }
  0x12   : > { %p119_p8 = scmp.ne.s32.totalorder %s818_s14, %s814_s13  ;;  %p120_p9 = scmp.eq.s32.totalorder %s518_s20, 1 }
  0x13   : > { %s927_s27 = scalar_select %p107_p7, %s818_s14, %s109_s26  }
  0x14   : > { %p125_p10 = scmp.ne.s32.totalorder %s814_s13, %s810_s12  ;;  %p126_p11 = scmp.eq.s32.totalorder %s519_s21, 1 }
  0x15   : > { %p933_p12 = por %p120_p9, %p119_p8  ;;  %p1087_p0 = scmp.ge.s32.totalorder %s838_s19, 2 }
  0x16   : > { %p937_p13 = por %p126_p11, %p125_p10 }
  0x17   : > { %168 = sbr.rel (%p1087_p0) target bundleno = 74 (0x4a), region = 16 }
  0x1c   : > { %171 = sbr.rel (!%p915_p4) target bundleno = 51 (0x33), region = 20 }
  0x21   : > { %185 = vsyncadd [#allocation3], 96  ;;  %s840_s30 = smov [#allocation2]   ;;  %s647_s7 = scalar_lea.hbm %s1083_s0, 32 }
  0x22   : > { %s190_s4 = sshll.u32 %s840_s30, 4  ;;  %p648_p1 = scmp.ne.s32.totalorder %s1083_s0, %s647_s7  ;;  %s191_s4 = int_to_ptr.vmem [resolvable:$true] %s190_s4 }
  0x23   : > { %p653_p2 = scmp.lt.s32.totalorder %s647_s7, %s647_s7 }
  0x25   : > { %p655_p3 = pnand %p653_p2, %p648_p1 }
  0x27   : > { %658 = shalt.err (!%p655_p3)
}
  0x28   : > { %s659_s10 = scalar_lea.vmem %s191_s4, 32  ;;  %s665_s11 = scalar_lea.vmem %s191_s4, 256 }
  0x29   : > { %p660_p5 = scmp.ne.s32.totalorder %s191_s4, %s659_s10  ;;  %p666_p7 = scmp.lt.s32.totalorder %s191_s4, %s191_s4 }
  0x2a   : > { %p667_p8 = scmp.lt.s32.totalorder %s665_s11, %s659_s10 }
  0x2c   : > { %p668_p9 = por %p667_p8, %p666_p7 }
  0x2e   : > { %p669_p10 = pnand %p668_p9, %p660_p5 }
  0x30   : > { %672 = shalt.err (!%p669_p10)
}
  0x31   : > { %s841_s15 = smov 32   ;;  %s842_s20 = smov 2  }
  0x32   : > { %196 = dma.hbm_to_vmem [thread:$0]  %s1083_s0, 32, %s191_s4, [#allocation3], %s841_s15, %s841_s15, %s842_s20  }
  0x33 PF: > { %199 = sbr.rel (!%p915_p4) target bundleno = 74 (0x4a), region = 24 }
  0x38   : > { %213 = vsyncadd [#allocation6], 64  ;;  %s843_s26 = smov [#allocation5]   ;;  %s673_s7 = scalar_lea.hbm %s1084_s1, 64 }
  0x39   : > { %s218_s30 = sshll.u32 %s843_s26, 4  ;;  %p674_p11 = scmp.ne.s32.totalorder %s1084_s1, %s673_s7  ;;  %s219_s30 = int_to_ptr.vmem [resolvable:$true] %s218_s30 }
  0x3a   : > { %p679_p1 = scmp.lt.s32.totalorder %s673_s7, %s673_s7 }
  0x3c   : > { %p681_p2 = pnand %p679_p1, %p674_p11 }
  0x3e   : > { %684 = shalt.err (!%p681_p2)
}
  0x3f   : > { %s685_s4 = scalar_lea.vmem %s219_s30, 64  ;;  %s691_s10 = scalar_lea.vmem %s219_s30, 256 }
  0x40   : > { %p686_p3 = scmp.ne.s32.totalorder %s219_s30, %s685_s4  ;;  %p692_p5 = scmp.lt.s32.totalorder %s219_s30, %s219_s30 }
  0x41   : > { %p693_p4 = scmp.lt.s32.totalorder %s691_s10, %s685_s4 }
  0x43   : > { %p694_p7 = por %p693_p4, %p692_p5 }
  0x45   : > { %p695_p8 = pnand %p694_p7, %p686_p3 }
  0x47   : > { %698 = shalt.err (!%p695_p8)
}
  0x48   : > { %s844_s23 = smov 64   ;;  %s845_s11 = smov 4  }
  0x49   : > { %224 = dma.hbm_to_vmem [thread:$0]  %s1084_s1, 64, %s219_s30, [#allocation6], %s844_s23, %s844_s23, %s845_s11  }
  0x4a PF: > { %p536_p9 = scmp.ge.s32.totalorder %s838_s19, 1  ;;  %p226_p10 = scmp.lt.s32.totalorder %s838_s19, 3 }
  0x4c   : > { %p227_p11 = pnand %p536_p9, %p226_p10 }
  0x4d   : > { %s232_s21 = sand.u32 (!%p227_p11), 1, %s826_s16  }
  0x4e   : > { %230 = sbr.rel (%p227_p11) target bundleno = 194 (0xc2), region = 28  ;;  %s537_s25 = sshll.u32 (!%p227_p11), %s232_s21, 3 }
  0x4f   : > { %s233_s26 = scalar_lea.sflag (!%p227_p11), [#allocation3], %s232_s21  ;;  %s969_s5 = scalar_lea.vmem (!%p227_p11), [#allocation2], %s537_s25 }
  0x53   : > { %788 = dma.done.wait (%p919_p6), %s233_s26, 128  }
  0x54   : > { %790 = vsyncadd (%p919_p6), %s233_s26, 4294967168  ;;  %s242_s30 = scalar_lea.sflag [#allocation6], %s232_s21  ;;  %s975_s6 = scalar_lea.vmem [#allocation5], %s537_s25 }
  0x55   : > { %792 = dma.done.wait (%p919_p6), %s242_s30, 128  }
  0x56   : > { %794 = vsyncadd (%p919_p6), %s242_s30, 4294967168  ;;  %s982_s7 = sand.u32 1, %s814_s13   ;;  %v846_v0 = vmov 0.0   ;;  %p541_p1 = scmp.ge.s32.totalorder %s830_s17, 1 }
  0x57   : > { %s539_s8 = sshll.u32 %s982_s7, 3  ;;  %p542_p6 = scmp.ne.s32.totalorder (!%p541_p1), %s830_s17, 0 }
  0x58   : > { %s985_s9 = scalar_lea.vmem [#allocation7], %s539_s8  ;;  %s988_s4 = scalar_lea.vmem [#allocation8], %s539_s8 }
  0x59   : > { %294 = vst [vmem:[%s985_s9] sm:$0xff] %v846_v0  ;;  %295 = vst [vmem:[%s988_s4] sm:$0xff] %v846_v0  ;;  %300 = sbr.rel (%p541_p1) target bundleno = 148 (0x94), region = 44 }
  0x5e   : > { %304 = sbr.rel (%p542_p6) target bundleno = 110 (0x6e), region = 48  ;;  %s543_s24 = sshll.u32 (!%p542_p6), %s830_s17, 3 }
  0x63   : > { %v306_v1 = vlaneseq  ;;  %v309_v2 = vstv %s543_s24  ;;  %v305_v4 = vld [vmem:[%s969_s5] sm:$0xff] }
  0x64   : > { %v315_v6 = vld [vmem:[%s985_s9] sm:$0xff] }
  0x65   : > { %v307_v3 = vshrl.u32 %v306_v1, 7 }
  0x67   : > { %v310_v5 = vadd.s32 %v309_v2, %v307_v3 }
  0x69   : > { %vm311_vm0 = vcmp.lt.s32.totalorder %v310_v5, 2 }
  0x6a   : > { %v314_v7 = vsel %vm311_vm0, %v305_v4, 0.0 }
  0x6b   : > { %v317_v8 = vadd.f32 %v315_v6, %v314_v7 }
  0x6d   : > { %318 = vst [vmem:[%s985_s9] sm:$0xff] %v317_v8 }
  0x6e PF: > { %p544_p2 = scmp.eq.s32.totalorder %s830_s17, 0 }
  0x70   : > { %322 = sbr.rel (%p544_p2) target bundleno = 122 (0x7a), region = 52 }
  0x75   : > { %v323_v9 = vld [vmem:[%s969_s5] sm:$0xff] }
  0x76   : > { %v324_v10 = vld [vmem:[%s985_s9] sm:$0xff] }
  0x77   : > { %v326_v11 = vadd.f32 %v324_v10, %v323_v9 }
  0x79   : > { %327 = vst [vmem:[%s985_s9] sm:$0xff] %v326_v11 }
  0x7a PF: > { %330 = sbr.rel (%p542_p6) target bundleno = 138 (0x8a), region = 56  ;;  %s546_s10 = sshll.u32 (!%p542_p6), %s830_s17, 3 }
  0x7f   : > { %v332_v12 = vlaneseq  ;;  %v335_v13 = vstv %s546_s10  ;;  %v331_v15 = vld [vmem:[%s975_s6] sm:$0xff] }
  0x80   : > { %v341_v17 = vld [vmem:[%s988_s4] sm:$0xff] }
  0x81   : > { %v333_v14 = vshrl.u32 %v332_v12, 7 }
  0x83   : > { %v336_v16 = vadd.s32 %v335_v13, %v333_v14 }
  0x85   : > { %vm337_vm1 = vcmp.lt.s32.totalorder %v336_v16, 3 }
  0x86   : > { %v340_v18 = vsel %vm337_vm1, %v331_v15, 0.0 }
  0x87   : > { %v343_v19 = vadd.f32 %v341_v17, %v340_v18 }
  0x89   : > { %344 = vst [vmem:[%s988_s4] sm:$0xff] %v343_v19 }
  0x8a PF: > { %347 = sbr.rel (%p544_p2) target bundleno = 148 (0x94), region = 60 }
  0x8f   : > { %v348_v20 = vld [vmem:[%s975_s6] sm:$0xff] }
  0x90   : > { %v349_v21 = vld [vmem:[%s988_s4] sm:$0xff] }
  0x91   : > { %v351_v22 = vadd.f32 %v349_v21, %v348_v20 }
  0x93   : > { %352 = vst [vmem:[%s988_s4] sm:$0xff] %v351_v22 }
  0x94 PF: > { %s550_s23 = sshll.u32 %s830_s17, 7  ;;  %s372_s21 = sshll.u32 %s985_s9, 4  ;;  %s373_s21 = int_to_ptr.vmem [resolvable:$true] %s372_s21 }
  0x95   : > { %s370_s20 = scalar_lea.hbm %s1085_s2, %s550_s23  ;;  %s354_s25 = scalar_lea.sflag [#allocation4], %s982_s7 }
  0x96   : > { %s699_s26 = scalar_lea.vmem %s373_s21, 128  ;;  %s847_s5 = smov [#allocation7]  }
  0x97   : > { %p700_p3 = scmp.ne.s32.totalorder %s373_s21, %s699_s26  ;;  %s703_s30 = sshll.u32 %s847_s5, 4  ;;  %s704_s30 = int_to_ptr.vmem [resolvable:$false] %s703_s30 }
  0x98   : > { %s705_s6 = scalar_lea.vmem %s704_s30, 256  ;;  %p706_p7 = scmp.lt.s32.totalorder %s373_s21, %s704_s30 }
  0x99   : > { %p701_p5 = pnand %p700_p3, %p933_p12  ;;  %p707_p8 = scmp.lt.s32.totalorder %s705_s6, %s699_s26 }
  0x9b   : > { %p702_p4 = pneg %p701_p5  ;;  %p708_p9 = por %p707_p8, %p706_p7 }
  0x9d   : > { %p709_p10 = pnand %p708_p9, %p702_p4 }
  0x9f   : > { %712 = shalt.err (!%p709_p10)
}
  0xa0   : > { %s713_s8 = scalar_lea.hbm %s370_s20, 128  ;;  %s717_s10 = scalar_lea.hbm %s1085_s2, 256 }
  0xa1   : > { %p714_p11 = scmp.ne.s32.totalorder %s370_s20, %s713_s8  ;;  %p718_p2 = scmp.lt.s32.totalorder %s370_s20, %s1085_s2 }
  0xa2   : > { %p719_p3 = scmp.lt.s32.totalorder %s717_s10, %s713_s8 }
  0xa3   : > { %p715_p1 = pnand %p714_p11, %p933_p12 }
  0xa4   : > { %p720_p5 = por %p719_p3, %p718_p2 }
  0xa5   : > { %p716_p6 = pneg %p715_p1 }
  0xa7   : > { %p721_p0 = pnand %p720_p5, %p716_p6 }
  0xa9   : > { %724 = shalt.err (!%p721_p0)
}
  0xaa   : > { %558 = dma.vmem_to_hbm [thread:$0]  (%p933_p12), %s373_s21, 128, %s370_s20, %s354_s25  }
  0xab   : > { %s383_s30 = scalar_lea.hbm %s1086_s3, %s550_s23  ;;  %s385_s6 = sshll.u32 %s988_s4, 4  ;;  %s386_s6 = int_to_ptr.vmem [resolvable:$true] %s385_s6 }
  0xac   : > { %s359_s9 = scalar_lea.sflag [#allocation9], %s982_s7  ;;  %s725_s24 = scalar_lea.vmem %s386_s6, 128 }
  0xad   : > { %p726_p4 = scmp.ne.s32.totalorder %s386_s6, %s725_s24  ;;  %s848_s8 = smov [#allocation8]  }
  0xae   : > { %s729_s10 = sshll.u32 %s848_s8, 4  ;;  %s730_s10 = int_to_ptr.vmem [resolvable:$false] %s729_s10 }
  0xaf   : > { %p727_p7 = pnand %p726_p4, %p933_p12  ;;  %s731_s11 = scalar_lea.vmem %s730_s10, 256 }
  0xb0   : > { %p732_p8 = scmp.lt.s32.totalorder %s386_s6, %s730_s10  ;;  %p733_p9 = scmp.lt.s32.totalorder %s731_s11, %s725_s24 }
  0xb1   : > { %p728_p0 = pneg %p727_p7 }
  0xb2   : > { %p734_p10 = por %p733_p9, %p732_p8 }
  0xb4   : > { %p735_p11 = pnand %p734_p10, %p728_p0 }
  0xb6   : > { %738 = shalt.err (!%p735_p11)
}
  0xb7   : > { %s739_s17 = scalar_lea.hbm %s383_s30, 128  ;;  %s743_s23 = scalar_lea.hbm %s1086_s3, 256 }
  0xb8   : > { %p740_p1 = scmp.ne.s32.totalorder %s383_s30, %s739_s17  ;;  %p744_p3 = scmp.lt.s32.totalorder %s383_s30, %s1086_s3 }
  0xb9   : > { %p745_p5 = scmp.lt.s32.totalorder %s743_s23, %s739_s17 }
  0xba   : > { %p741_p6 = pnand %p740_p1, %p933_p12 }
  0xbb   : > { %p746_p4 = por %p745_p5, %p744_p3 }
  0xbc   : > { %p742_p2 = pneg %p741_p6 }
  0xbe   : > { %p747_p7 = pnand %p746_p4, %p742_p2 }
  0xc0   : > { %750 = shalt.err (!%p747_p7)
}
  0xc1   : > { %559 = dma.vmem_to_hbm [thread:$0]  (%p933_p12), %s386_s6, 128, %s383_s30, %s359_s9  }
  0xc2 PF: > { %s397_s25 = sand.u32 1, %s810_s12   ;;  %p1092_p0 = scmp.ge.s32.totalorder %s838_s19, 2 }
  0xc3   : > { %s398_s15 = scalar_lea.sflag [#allocation4], %s397_s25 }
  0xc4   : > { %p563_p8 = pnand %p1092_p0, %p937_p13 }
  0xc6   : > { %p564_p9 = pneg %p563_p8 }
  0xc8   : > { %796 = dma.done.wait (%p564_p9), %s398_s15, 128  }
  0xc9   : > { %798 = vsyncadd (%p564_p9), %s398_s15, 4294967168  ;;  %s407_s26 = scalar_lea.sflag [#allocation9], %s397_s25 }
  0xca   : > { %800 = dma.done.wait (%p564_p9), %s407_s26, 128  }
  0xcb   : > { %802 = vsyncadd (%p564_p9), %s407_s26, 4294967168  ;;  %s26_s19 = sadd.s32 1, %s838_s19   ;;  %s1093_s12 = smov %s814_s13 }
  0xcc   : > { %p23_p10 = scmp.ge.s32.totalorder %s26_s19, 4   ;;  %s1094_s13 = smov %s818_s14 }
  0xcd   : > { %s1095_s14 = smov %s927_s27  ;;  %s1096_s15 = smov %s826_s16 }
  0xce   : > { %s1073_s16 = smov 0   ;;  %s1097_s17 = smov %s834_s18 }
  0xcf   : > { %s1098_s18 = smov %s1100_s22  ;;  %25 = sbr.rel (!%p23_p10) target bundleno = 11 (0xb), region = 127 }
  0xd4   :  { %412 = vsyncpa [#allocation3], 1 }
  0xd5   :  { %414 = vsyncpa [#allocation3 + $0x1], 1 }
  0xd6   :  { %415 = vsyncpa [#allocation6], 1 }
  0xd7   :  { %417 = vsyncpa [#allocation6 + $0x1], 1 }
  0xd8   :  { %418 = vsyncpa [#allocation4], 1 }
  0xd9   :  { %420 = vsyncpa [#allocation4 + $0x1], 1 }
  0xda   :  { %421 = vsyncpa [#allocation9], 1 }
  0xdb   :  { %423 = vsyncpa [#allocation9 + $0x1], 1 }

</bundles_post_ra>
